<compile_context>
chip_gen: v5e
topology: v5e:2x2
jax: 0.10.0
libtpu: 0.0.40
codegen_flags: <defaults>
</compile_context>

<pallas_src>
import math

import jax
import jax.numpy as jnp
from jax.experimental import pallas as pl
from jax.experimental.pallas import tpu as pltpu


# ------------------------------ Pallas kernel -------------------------------

def _linear_ae_kernel(x_ref, w1_ref, b1_ref, w2_ref, b2_ref, o_ref):
    # fc1 + ReLU  (MXU matmul, f32 accumulate; hidden stays in vregs/VMEM)
    h = jnp.dot(x_ref[...], w1_ref[...], preferred_element_type=jnp.float32)
    h = jnp.maximum(h + b1_ref[...], 0.0)
    # fc2 + sigmoid.  exp and approximate reciprocal both use the EUP slot.
    z = jnp.dot(h, w2_ref[...], preferred_element_type=jnp.float32) + b2_ref[...]
    o_ref[...] = pl.reciprocal(1.0 + jnp.exp(-z), approx=True).astype(o_ref.dtype)


# -------------------------------- wrapper ------------------------------------

def linear_autoencoder_forward(x, params):
    """x: (B, 784) float32.  params hold torch-layout fc weights/biases."""
    w1 = jnp.transpose(params["fc1_w"])          # (784, H)
    b1 = params["fc1_b"].reshape(1, -1)          # (1, H)
    w2 = jnp.transpose(params["fc2_w"])          # (H, 784)
    b2 = params["fc2_b"].reshape(1, -1)          # (1, 784)

    B, _ = x.shape
    d_out = w2.shape[1]
    Bp = max(8, ((B + 7) // 8) * 8)              # sublane-align the row dim
    if Bp != B:
        x = jnp.pad(x, ((0, Bp - B), (0, 0)))

    vmem = pl.BlockSpec(memory_space=pltpu.MemorySpace.VMEM)
    y = pl.pallas_call(
        _linear_ae_kernel,
        out_shape=jax.ShapeDtypeStruct((Bp, d_out), jnp.float32),
        in_specs=[vmem, vmem, vmem, vmem, vmem],  # everything resident, no grid
        out_specs=vmem,
    )(x, w1, b1, w2, b2)
    return y[:B]


# ------------------------------ param init -----------------------------------

def init_params(key, encoding_dim=32, in_features=28 * 28):
    """Matches torch.nn.Linear default init: U(-1/sqrt(fan_in), 1/sqrt(fan_in))."""
    k1, k2, k3, k4 = jax.random.split(key, 4)
    b_in = 1.0 / math.sqrt(in_features)
    b_hid = 1.0 / math.sqrt(encoding_dim)
    return {
        "fc1_w": jax.random.uniform(k1, (encoding_dim, in_features), jnp.float32, -b_in, b_in),
        "fc1_b": jax.random.uniform(k2, (encoding_dim,), jnp.float32, -b_in, b_in),
        "fc2_w": jax.random.uniform(k3, (in_features, encoding_dim), jnp.float32, -b_hid, b_hid),
        "fc2_b": jax.random.uniform(k4, (in_features,), jnp.float32, -b_hid, b_hid),
    }


# ---------------------------------- main --------------------------------------

if __name__ == "__main__":
    key = jax.random.PRNGKey(0)
    kp, kx = jax.random.split(key)
    params = init_params(kp, encoding_dim=32)
    x = jax.random.normal(kx, (8, 28 * 28), jnp.float32)   # (B, 784) like PyTorch

    fwd = jax.jit(linear_autoencoder_forward)
    y = fwd(x, params)
    jax.block_until_ready(y)

    # Pure-JAX reference of the same forward pass.
    h_ref = jnp.maximum(x @ params["fc1_w"].T + params["fc1_b"], 0.0)
    ref = jax.nn.sigmoid(h_ref @ params["fc2_w"].T + params["fc2_b"])

    assert y.shape == (8, 28 * 28), y.shape
    assert bool(jnp.allclose(y, ref, atol=5e-3, rtol=1e-3)), float(jnp.max(jnp.abs(y - ref)))
    print("KERNEL_OK")
</pallas_src>

<mosaic_0001>
module attributes {stable_mosaic.version = 11 : i64} {
  func.func @_linear_ae_kernel(%arg0: memref<8x784xf32, #tpu.memory_space<vmem>>, %arg1: memref<784x32xf32, #tpu.memory_space<vmem>>, %arg2: memref<1x32xf32, #tpu.memory_space<vmem>>, %arg3: memref<32x784xf32, #tpu.memory_space<vmem>>, %arg4: memref<1x784xf32, #tpu.memory_space<vmem>>, %arg5: memref<8x784xf32, #tpu.memory_space<vmem>>) attributes {dimension_semantics = [], scalar_prefetch = 0 : i64, scratch_operands = 0 : i64, tpu.core_type = #tpu.core_type<tc>} {
    %c0 = arith.constant 0 : index
    %c0_0 = arith.constant 0 : index
    %0 = vector.load %arg0[%c0, %c0_0] : memref<8x784xf32, #tpu.memory_space<vmem>>, vector<8x784xf32>
    %c0_1 = arith.constant 0 : index
    %c0_2 = arith.constant 0 : index
    %1 = vector.load %arg1[%c0_1, %c0_2] : memref<784x32xf32, #tpu.memory_space<vmem>>, vector<784x32xf32>
    %cst = arith.constant dense<0.000000e+00> : vector<8x32xf32>
    %2 = tpu.matmul %0, %1, %cst {dimension_numbers = #tpu.dot_dimension_numbers<[1], [0], [0], [1], [0, 0, 1, 1], [], []>} : vector<8x784xf32>, vector<784x32xf32>, vector<8x32xf32> -> vector<8x32xf32>
    %c0_3 = arith.constant 0 : index
    %c0_4 = arith.constant 0 : index
    %3 = vector.load %arg2[%c0_3, %c0_4] : memref<1x32xf32, #tpu.memory_space<vmem>>, vector<1x32xf32>
    %4 = vector.broadcast %3 : vector<1x32xf32> to vector<8x32xf32>
    %5 = arith.addf %2, %4 : vector<8x32xf32>
    %cst_5 = arith.constant 0.000000e+00 : f32
    %6 = vector.broadcast %cst_5 : f32 to vector<8x32xf32>
    %7 = arith.maximumf %5, %6 : vector<8x32xf32>
    %c0_6 = arith.constant 0 : index
    %c0_7 = arith.constant 0 : index
    %8 = vector.load %arg3[%c0_6, %c0_7] : memref<32x784xf32, #tpu.memory_space<vmem>>, vector<32x784xf32>
    %cst_8 = arith.constant dense<0.000000e+00> : vector<8x784xf32>
    %9 = tpu.matmul %7, %8, %cst_8 {dimension_numbers = #tpu.dot_dimension_numbers<[1], [0], [0], [1], [0, 0, 1, 1], [], []>} : vector<8x32xf32>, vector<32x784xf32>, vector<8x784xf32> -> vector<8x784xf32>
    %c0_9 = arith.constant 0 : index
    %c0_10 = arith.constant 0 : index
    %10 = vector.load %arg4[%c0_9, %c0_10] : memref<1x784xf32, #tpu.memory_space<vmem>>, vector<1x784xf32>
    %11 = vector.broadcast %10 : vector<1x784xf32> to vector<8x784xf32>
    %12 = arith.addf %9, %11 : vector<8x784xf32>
    %cst_11 = arith.constant 0.000000e+00 : f32
    %13 = vector.broadcast %cst_11 : f32 to vector<8x784xf32>
    %14 = arith.subf %13, %12 : vector<8x784xf32>
    %15 = math.exp %14 : vector<8x784xf32>
    %cst_12 = arith.constant 1.000000e+00 : f32
    %16 = vector.broadcast %cst_12 : f32 to vector<8x784xf32>
    %17 = arith.addf %16, %15 : vector<8x784xf32>
    %18 = tpu.reciprocal %17 {approx = true} : vector<8x784xf32> -> vector<8x784xf32>
    %c0_13 = arith.constant 0 : index
    %c0_14 = arith.constant 0 : index
    %19 = vector.load %arg5[%c0_13, %c0_14] : memref<8x784xf32, #tpu.memory_space<vmem>>, vector<8x784xf32>
    tpu.vector_store %arg5[%c0_13, %c0_14], %18 {strides = array<i32>} : memref<8x784xf32, #tpu.memory_space<vmem>>, vector<8x784xf32>,
    return
  }
}

</mosaic_0001>

<bundles_post_ra>
// kernel: linear_autoencoder_forward.1
= control target key start
LH: loop header
LB: loop body
LE: loop exit
PB: predicated region body
PF: predicated region fallthrough
CT: control target
= control target key end

     0   :  { %s1033_s0 = inlined_call_operand.vmem [shape: f32[8,784], index: 0, kind: input, shape index: {}]   ;;  %s1034_s1 = inlined_call_operand.vmem [shape: f32[784,32], index: 1, kind: input, shape index: {}]   ;;  %s1035_s2 = inlined_call_operand.vmem [shape: f32[1,32], index: 2, kind: input, shape index: {}]   ;;  %s1036_s3 = inlined_call_operand.vmem [shape: f32[32,784], index: 3, kind: input, shape index: {}]   ;;  %s1037_s4 = inlined_call_operand.vmem [shape: f32[1,784], index: 4, kind: input, shape index: {}]   ;;  %s1038_s5 = inlined_call_operand.hbm [shape: f32[8,784], index: 5, kind: output, shape index: {}]  }
   0x1   :  { %v43_v0 = vld [vmem:[%s1034_s1 + $0x78] sm:$0xff]  ;;  %v42_v1 = vld [vmem:[%s1034_s1 + $0x70] sm:$0xff]  ;;  %v41_v4 = vld [vmem:[%s1034_s1 + $0x68] sm:$0xff] }
   0x2   :  { %v59_v2 = vld [vmem:[%s1034_s1 + $0xf8] sm:$0xff]  ;;  %134 = vmatpush.msra.mxu0 %v43_v0  ;;  %v58_v3 = vld [vmem:[%s1034_s1 + $0xf0] sm:$0xff]  ;;  %v57_v5 = vld [vmem:[%s1034_s1 + $0xe8] sm:$0xff] }
   0x3   :  { %154 = vmatpush.msra.mxu1 %v59_v2  ;;  %v40_v6 = vld [vmem:[%s1034_s1 + $0x60] sm:$0xff]  ;;  %v39_v8 = vld [vmem:[%s1034_s1 + $0x58] sm:$0xff]  ;;  %v38_v10 = vld [vmem:[%s1034_s1 + $0x50] sm:$0xff] }
   0x4   :  { %135 = vmatpush.msra.mxu0 %v42_v1  ;;  %v56_v7 = vld [vmem:[%s1034_s1 + $0xe0] sm:$0xff]  ;;  %v55_v9 = vld [vmem:[%s1034_s1 + $0xd8] sm:$0xff]  ;;  %v54_v12 = vld [vmem:[%s1034_s1 + $0xd0] sm:$0xff] }
   0x5   :  { %155 = vmatpush.msra.mxu1 %v58_v3  ;;  %v75_v11 = vld [vmem:[%s1034_s1 + $0x178] sm:$0xff]  ;;  %v74_v13 = vld [vmem:[%s1034_s1 + $0x170] sm:$0xff]  ;;  %v73_v15 = vld [vmem:[%s1034_s1 + $0x168] sm:$0xff] }
   0x6   :  { %136 = vmatpush.msra.mxu0 %v41_v4  ;;  %174 = vmatpush.msra.mxu2 %v75_v11  ;;  %v91_v14 = vld [vmem:[%s1034_s1 + $0x1f8] sm:$0xff]  ;;  %v90_v16 = vld [vmem:[%s1034_s1 + $0x1f0] sm:$0xff]  ;;  %v37_v17 = vld [vmem:[%s1034_s1 + $0x48] sm:$0xff] }
   0x7   :  { %156 = vmatpush.msra.mxu1 %v57_v5  ;;  %v53_v18 = vld [vmem:[%s1034_s1 + $0xc8] sm:$0xff]  ;;  %194 = vmatpush.msra.mxu3 %v91_v14  ;;  %v72_v19 = vld [vmem:[%s1034_s1 + $0x160] sm:$0xff]  ;;  %v71_v23 = vld [vmem:[%s1034_s1 + $0x158] sm:$0xff] }
   0x8   :  { %137 = vmatpush.msra.mxu0 %v40_v6  ;;  %175 = vmatpush.msra.mxu2 %v74_v13  ;;  %v89_v20 = vld [vmem:[%s1034_s1 + $0x1e8] sm:$0xff]  ;;  %v36_v21 = vld [vmem:[%s1034_s1 + $0x40] sm:$0xff]  ;;  %v35_v25 = vld [vmem:[%s1034_s1 + $0x38] sm:$0xff] }
   0x9   :  { %157 = vmatpush.msra.mxu1 %v56_v7  ;;  %v52_v22 = vld [vmem:[%s1034_s1 + $0xc0] sm:$0xff]  ;;  %195 = vmatpush.msra.mxu3 %v90_v16  ;;  %v51_v26 = vld [vmem:[%s1034_s1 + $0xb8] sm:$0xff]  ;;  %v70_v27 = vld [vmem:[%s1034_s1 + $0x150] sm:$0xff] }
   0xa   :  { %138 = vmatpush.msra.mxu0 %v39_v8  ;;  %176 = vmatpush.msra.mxu2 %v73_v15  ;;  %v88_v24 = vld [vmem:[%s1034_s1 + $0x1e0] sm:$0xff]  ;;  %v87_v28 = vld [vmem:[%s1034_s1 + $0x1d8] sm:$0xff]  ;;  %v34_v29 = vld [vmem:[%s1034_s1 + $0x30] sm:$0xff] }
   0xb   :  { %158 = vmatpush.msra.mxu1 %v55_v9  ;;  %196 = vmatpush.msra.mxu3 %v89_v20  ;;  %v50_v30 = vld [vmem:[%s1034_s1 + $0xb0] sm:$0xff]  ;;  %v69_v31 = vld [vmem:[%s1034_s1 + $0x148] sm:$0xff]  ;;  %v68_v35 = vld [vmem:[%s1034_s1 + $0x140] sm:$0xff] }
   0xc   :  { %139 = vmatpush.msra.mxu0 %v38_v10  ;;  %177 = vmatpush.msra.mxu2 %v72_v19  ;;  %v86_v32 = vld [vmem:[%s1034_s1 + $0x1d0] sm:$0xff]  ;;  %v33_v33 = vld [vmem:[%s1034_s1 + $0x28] sm:$0xff]  ;;  %v32_v37 = vld [vmem:[%s1034_s1 + $0x20] sm:$0xff] }
   0xd   :  { %159 = vmatpush.msra.mxu1 %v54_v12  ;;  %197 = vmatpush.msra.mxu3 %v88_v24  ;;  %v49_v34 = vld [vmem:[%s1034_s1 + $0xa8] sm:$0xff]  ;;  %v48_v38 = vld [vmem:[%s1034_s1 + $0xa0] sm:$0xff]  ;;  %v67_v39 = vld [vmem:[%s1034_s1 + $0x138] sm:$0xff] }
   0xe   :  { %140 = vmatpush.msra.mxu0 %v37_v17  ;;  %178 = vmatpush.msra.mxu2 %v71_v23  ;;  %v85_v36 = vld [vmem:[%s1034_s1 + $0x1c8] sm:$0xff]  ;;  %v84_v40 = vld [vmem:[%s1034_s1 + $0x1c0] sm:$0xff]  ;;  %v31_v41 = vld [vmem:[%s1034_s1 + $0x18] sm:$0xff] }
   0xf   :  { %160 = vmatpush.msra.mxu1 %v53_v18  ;;  %198 = vmatpush.msra.mxu3 %v87_v28  ;;  %v47_v42 = vld [vmem:[%s1034_s1 + $0x98] sm:$0xff]  ;;  %v66_v43 = vld [vmem:[%s1034_s1 + $0x130] sm:$0xff]  ;;  %v65_v47 = vld [vmem:[%s1034_s1 + $0x128] sm:$0xff] }
  0x10   :  { %141 = vmatpush.msra.mxu0 %v36_v21  ;;  %179 = vmatpush.msra.mxu2 %v70_v27  ;;  %v83_v44 = vld [vmem:[%s1034_s1 + $0x1b8] sm:$0xff]  ;;  %v30_v45 = vld [vmem:[%s1034_s1 + $0x10] sm:$0xff]  ;;  %v29_v49 = vld [vmem:[%s1034_s1 + $0x8] sm:$0xff] }
  0x11   :  { %161 = vmatpush.msra.mxu1 %v52_v22  ;;  %199 = vmatpush.msra.mxu3 %v86_v32  ;;  %v46_v46 = vld [vmem:[%s1034_s1 + $0x90] sm:$0xff]  ;;  %v45_v50 = vld [vmem:[%s1034_s1 + $0x88] sm:$0xff]  ;;  %v64_v51 = vld [vmem:[%s1034_s1 + $0x120] sm:$0xff] }
  0x12   :  { %142 = vmatpush.msra.mxu0 %v35_v25  ;;  %180 = vmatpush.msra.mxu2 %v69_v31  ;;  %v82_v48 = vld [vmem:[%s1034_s1 + $0x1b0] sm:$0xff]  ;;  %v81_v52 = vld [vmem:[%s1034_s1 + $0x1a8] sm:$0xff]  ;;  %v28_v53 = vld [vmem:[%s1034_s1] sm:$0xff] }
  0x13   :  { %162 = vmatpush.msra.mxu1 %v51_v26  ;;  %200 = vmatpush.msra.mxu3 %v85_v36  ;;  %v44_v54 = vld [vmem:[%s1034_s1 + $0x80] sm:$0xff]  ;;  %v107_v55 = vld [vmem:[%s1034_s1 + $0x278] sm:$0xff]  ;;  %v106_v59 = vld [vmem:[%s1034_s1 + $0x270] sm:$0xff] }
  0x14   :  { %143 = vmatpush.msra.mxu0 %v34_v29  ;;  %181 = vmatpush.msra.mxu2 %v68_v35  ;;  %v123_v56 = vld [vmem:[%s1034_s1 + $0x2f8] sm:$0xff]  ;;  %v80_v58 = vld [vmem:[%s1034_s1 + $0x1a0] sm:$0xff]  ;;  %v122_v60 = vld [vmem:[%s1034_s1 + $0x2f0] sm:$0xff] }
  0x15   :  { %163 = vmatpush.msra.mxu1 %v50_v30  ;;  %201 = vmatpush.msra.mxu3 %v84_v40  ;;  %v63_v57 = vld [vmem:[%s1034_s1 + $0x118] sm:$0xff]  ;;  %v62_v61 = vld [vmem:[%s1034_s1 + $0x110] sm:$0xff]  ;;  %v105_v63 = vld [vmem:[%s1034_s1 + $0x268] sm:$0xff] }
  0x16   :  { %144 = vmatpush.msra.mxu0 %v33_v33  ;;  %182 = vmatpush.msra.mxu2 %v67_v39  ;;  %v79_v62 = vld [vmem:[%s1034_s1 + $0x198] sm:$0xff]  ;;  %v121_v0 = vld [vmem:[%s1034_s1 + $0x2e8] sm:$0xff]  ;;  %v104_v1 = vld [vmem:[%s1034_s1 + $0x260] sm:$0xff] }
  0x17   :  { %164 = vmatpush.msra.mxu1 %v49_v34  ;;  %202 = vmatpush.msra.mxu3 %v83_v44  ;;  %v61_v2 = vld [vmem:[%s1034_s1 + $0x108] sm:$0xff]  ;;  %v78_v3 = vld [vmem:[%s1034_s1 + $0x190] sm:$0xff]  ;;  %v120_v4 = vld [vmem:[%s1034_s1 + $0x2e0] sm:$0xff] }
  0x18   :  { %145 = vmatpush.msra.mxu0 %v32_v37  ;;  %183 = vmatpush.msra.mxu2 %v66_v43 }
  0x19   :  { %165 = vmatpush.msra.mxu1 %v48_v38  ;;  %203 = vmatpush.msra.mxu3 %v82_v48 }
  0x1a   :  { %146 = vmatpush.msra.mxu0 %v31_v41  ;;  %184 = vmatpush.msra.mxu2 %v65_v47 }
  0x1b   :  { %166 = vmatpush.msra.mxu1 %v47_v42  ;;  %204 = vmatpush.msra.mxu3 %v81_v52 }
  0x1c   :  { %147 = vmatpush.msra.mxu0 %v30_v45  ;;  %185 = vmatpush.msra.mxu2 %v64_v51 }
  0x1d   :  { %167 = vmatpush.msra.mxu1 %v46_v46  ;;  %205 = vmatpush.msra.mxu3 %v80_v58 }
  0x1e   :  { %148 = vmatpush.msra.mxu0 %v29_v49  ;;  %186 = vmatpush.msra.mxu2 %v63_v57 }
  0x1f   :  { %168 = vmatpush.msra.mxu1 %v45_v50  ;;  %206 = vmatpush.msra.mxu3 %v79_v62 }
  0x20   :  { %149 = vmatpush.msra.mxu0 %v28_v53  ;;  %187 = vmatpush.msra.mxu2 %v62_v61 }
  0x21   :  { %169 = vmatpush.msra.mxu1 %v44_v54 }
  0x22   :  { %214 = vmatpush.msrb.mxu0 %v107_v55 }
  0x23   :  { %234 = vmatpush.msrb.mxu1 %v123_v56 }
  0x24   :  { %215 = vmatpush.msrb.mxu0 %v106_v59 }
  0x25   :  { %235 = vmatpush.msrb.mxu1 %v122_v60 }
  0x26   :  { %10 = vsyncpa [#allocation3], 0  ;;  %216 = vmatpush.msrb.mxu0 %v105_v63  ;;  %v60_v5 = vld [vmem:[%s1034_s1 + $0x100] sm:$0xff]  ;;  %v77_v6 = vld [vmem:[%s1034_s1 + $0x188] sm:$0xff]  ;;  %188 = vmatpush.msra.mxu2 %v61_v2  ;;  %vm130_vm0 = vcmask 130048   ;;  %vm319_vm1 = vcmask 261120  }
  0x27   :  { %236 = vmatpush.msrb.mxu1 %v121_v0  ;;  %v103_v7 = vld [vmem:[%s1034_s1 + $0x258] sm:$0xff]  ;;  %207 = vmatpush.msra.mxu3 %v78_v3  ;;  %v23_v9 = vld [vmem:[%s1033_s0 + $0x10] sm:$0xff]  ;;  %v76_v10 = vld [vmem:[%s1034_s1 + $0x180] sm:$0xff] }
  0x28   :  { %v119_v8 = vld [vmem:[%s1034_s1 + $0x2d8] sm:$0xff]  ;;  %217 = vmatpush.msrb.mxu0 %v104_v1  ;;  %v102_v11 = vld [vmem:[%s1034_s1 + $0x250] sm:$0xff]  ;;  %189 = vmatpush.msra.mxu2 %v60_v5  ;;  %v125_v13 = vld [vmem:[%s1034_s1 + $0x308] sm:$0xff] }
  0x29   :  { %237 = vmatpush.msrb.mxu1 %v120_v4  ;;  %v118_v12 = vld [vmem:[%s1034_s1 + $0x2d0] sm:$0xff]  ;;  %208 = vmatpush.msra.mxu3 %v77_v6  ;;  %v21_v14 = vld [vmem:[%s1033_s0] sm:$0xff]  ;;  %v101_v15 = vld [vmem:[%s1034_s1 + $0x248] sm:$0xff] }
  0x2a   :  { %218 = vmatpush.msrb.mxu0 %v103_v7  ;;  %v117_v16 = vld [vmem:[%s1034_s1 + $0x2c8] sm:$0xff]  ;;  %190 = vmatmul.f32.vlgmr.msra.gmra.mxu2 %v23_v9  ;;  %v24_v17 = vld [vmem:[%s1033_s0 + $0x18] sm:$0xff]  ;;  %v100_v19 = vld [vmem:[%s1034_s1 + $0x240] sm:$0xff] }
  0x2b   :  { %238 = vmatpush.msrb.mxu1 %v119_v8  ;;  %209 = vmatpush.msra.mxu3 %v76_v10  ;;  %v22_v18 = vld [vmem:[%s1033_s0 + $0x8] sm:$0xff]  ;;  %v116_v20 = vld [vmem:[%s1034_s1 + $0x2c0] sm:$0xff]  ;;  %v99_v22 = vld [vmem:[%s1034_s1 + $0x238] sm:$0xff] }
  0x2c   :  { %219 = vmatpush.msrb.mxu0 %v102_v11  ;;  %268 = vmatpush.msrb.mxu2 %v125_v13  ;;  %v124_v21 = vld [vmem:[%s1034_s1 + $0x300] sm:$0xff]  ;;  %v115_v23 = vld [vmem:[%s1034_s1 + $0x2b8] sm:$0xff]  ;;  %v27_v24 = vld [vmem:[%s1033_s0 + $0x30] sm:$0xff] }
  0x2d   :  { %239 = vmatpush.msrb.mxu1 %v118_v12  ;;  %150 = vmatmul.f32.vlgmr.msra.gmra.mxu0 %v21_v14  ;;  %v98_v25 = vld [vmem:[%s1034_s1 + $0x230] sm:$0xff]  ;;  %v97_v27 = vld [vmem:[%s1034_s1 + $0x228] sm:$0xff]  ;;  %v96_v29 = vld [vmem:[%s1034_s1 + $0x220] sm:$0xff] }
  0x2e   :  { %220 = vmatpush.msrb.mxu0 %v101_v15  ;;  %210 = vmatmul.f32.vlgmr.msra.gmra.mxu3 %v24_v17  ;;  %v114_v26 = vld [vmem:[%s1034_s1 + $0x2b0] sm:$0xff]  ;;  %v113_v28 = vld [vmem:[%s1034_s1 + $0x2a8] sm:$0xff]  ;;  %v112_v30 = vld [vmem:[%s1034_s1 + $0x2a0] sm:$0xff] }
  0x2f   :  { %240 = vmatpush.msrb.mxu1 %v117_v16  ;;  %269 = vmatpush.msrb.mxu2 %v124_v21  ;;  %v95_v31 = vld [vmem:[%s1034_s1 + $0x218] sm:$0xff]  ;;  %v94_v33 = vld [vmem:[%s1034_s1 + $0x210] sm:$0xff]  ;;  %v93_v35 = vld [vmem:[%s1034_s1 + $0x208] sm:$0xff] }
  0x30   :  { %170 = vmatmul.f32.vlgmr.msra.gmra.mxu1 %v22_v18  ;;  %221 = vmatpush.msrb.mxu0 %v100_v19  ;;  %v111_v32 = vld [vmem:[%s1034_s1 + $0x298] sm:$0xff]  ;;  %v110_v34 = vld [vmem:[%s1034_s1 + $0x290] sm:$0xff]  ;;  %v109_v36 = vld [vmem:[%s1034_s1 + $0x288] sm:$0xff] }
  0x31   :  { %241 = vmatpush.msrb.mxu1 %v116_v20  ;;  %v92_v37 = vld [vmem:[%s1034_s1 + $0x200] sm:$0xff]  ;;  %v26_v40 = vld [vmem:[%s1033_s0 + $0x28] sm:$0xff]  ;;  %v297_v42 = vld [vmem:[%s1036_s3 + $0xb0] sm:$0xff] }
  0x32   :  { %222 = vmatpush.msrb.mxu0 %v99_v22  ;;  %521 = vmatmul.msk.f32.vlgmr.msrb.gmra.mxu2 %vm130_vm0, %v27_v24  ;;  %v108_v38 = vld [vmem:[%s1034_s1 + $0x280] sm:$0xff]  ;;  %v296_v41 = vld [vmem:[%s1036_s3 + $0xa8] sm:$0xff]  ;;  %v289_v43 = vld [vmem:[%s1036_s3 + $0x70] sm:$0xff] }
  0x33   :  { %242 = vmatpush.msrb.mxu1 %v115_v23  ;;  %v25_v39 = vld [vmem:[%s1033_s0 + $0x20] sm:$0xff]  ;;  %335 = vmatpush.msrb.mxu3 %v296_v41  ;;  %v290_v44 = vld [vmem:[%s1036_s3 + $0x78] sm:$0xff]  ;;  %v276_v48 = vld [vmem:[%s1036_s3 + $0x8] sm:$0xff] }
  0x34   :  { %223 = vmatpush.msrb.mxu0 %v98_v25  ;;  %355 = vmatpush.msra.mxu2 %v297_v42  ;;  %v282_v45 = vld [vmem:[%s1036_s3 + $0x38] sm:$0xff]  ;;  %v283_v46 = vld [vmem:[%s1036_s3 + $0x40] sm:$0xff]  ;;  %v292_v52 = vld [vmem:[%s1036_s3 + $0x88] sm:$0xff] }
  0x35   :  { %243 = vmatpush.msrb.mxu1 %v114_v26  ;;  %336 = vmatpush.msrb.mxu3 %v289_v43  ;;  %v275_v47 = vld [vmem:[%s1036_s3] sm:$0xff]  ;;  %v298_v49 = vld [vmem:[%s1036_s3 + $0xb8] sm:$0xff]  ;;  %v284_v53 = vld [vmem:[%s1036_s3 + $0x48] sm:$0xff] }
  0x36   :  { %224 = vmatpush.msrb.mxu0 %v97_v27  ;;  %356 = vmatpush.msra.mxu2 %v290_v44  ;;  %v299_v50 = vld [vmem:[%s1036_s3 + $0xc0] sm:$0xff]  ;;  %v285_v54 = vld [vmem:[%s1036_s3 + $0x50] sm:$0xff]  ;;  %v278_v57 = vld [vmem:[%s1036_s3 + $0x18] sm:$0xff] }
  0x37   :  { %244 = vmatpush.msrb.mxu1 %v113_v28  ;;  %337 = vmatpush.msrb.mxu3 %v282_v45  ;;  %v291_v51 = vld [vmem:[%s1036_s3 + $0x80] sm:$0xff]  ;;  %v277_v56 = vld [vmem:[%s1036_s3 + $0x10] sm:$0xff]  ;;  %v300_v9 = vld [vmem:[%s1036_s3 + $0xc8] sm:$0xff] }
  0x38   :  { %225 = vmatpush.msrb.mxu0 %v96_v29  ;;  %357 = vmatpush.msra.mxu2 %v283_v46  ;;  %v530_v55 = vld [vmem:[%s1035_s2] ss:$0 sm:$0xff]  ;;  %v301_v10 = vld [vmem:[%s1036_s3 + $0xd0] sm:$0xff]  ;;  %v294_v12 = vld [vmem:[%s1036_s3 + $0x98] sm:$0xff]  ;;  %s512_s2 = sshll.u32 %s1038_s5, 4  ;;  %s513_s2 = int_to_ptr.hbm [resolvable:$true] %s512_s2 }
  0x39   :  { %245 = vmatpush.msrb.mxu1 %v112_v30  ;;  %338 = vmatpush.msrb.mxu3 %v275_v47  ;;  %v293_v11 = vld [vmem:[%s1036_s3 + $0x90] sm:$0xff]  ;;  %v286_v13 = vld [vmem:[%s1036_s3 + $0x58] sm:$0xff]  ;;  %v287_v14 = vld [vmem:[%s1036_s3 + $0x60] sm:$0xff] }
  0x3a   :  { %226 = vmatpush.msrb.mxu0 %v95_v31  ;;  %358 = vmatpush.msra.mxu2 %v276_v48  ;;  %v279_v15 = vld [vmem:[%s1036_s3 + $0x20] sm:$0xff]  ;;  %v280_v16 = vld [vmem:[%s1036_s3 + $0x28] sm:$0xff]  ;;  %v302_v17 = vld [vmem:[%s1036_s3 + $0xd8] sm:$0xff] }
  0x3b   :  { %246 = vmatpush.msrb.mxu1 %v111_v32  ;;  %375 = vmatpush.msra.mxu3 %v298_v49  ;;  %v295_v18 = vld [vmem:[%s1036_s3 + $0xa0] sm:$0xff]  ;;  %v288_v19 = vld [vmem:[%s1036_s3 + $0x68] sm:$0xff]  ;;  %v281_v20 = vld [vmem:[%s1036_s3 + $0x30] sm:$0xff]  ;;  %s585_s3 = smov [#allocation2]  }
  0x3c   :  { %227 = vmatpush.msrb.mxu0 %v94_v33  ;;  %395 = vmatpush.msrb.mxu2 %v299_v50  ;;  %v303_v21 = vld [vmem:[%s1037_s4] sm:$0x7f]  ;;  %s510_s4 = sshll.u32 %s585_s3, 4  ;;  %s511_s4 = int_to_ptr.vmem [resolvable:$true] %s510_s4 }
  0x3d   :  { %247 = vmatpush.msrb.mxu1 %v110_v34  ;;  %376 = vmatpush.msra.mxu3 %v291_v51  ;;  %v305_v22 = vperm.slane %v303_v21, 0  ;;  %v306_v23 = vperm.slane %v303_v21, 1  ;;  %v307_v32 = vperm.slane %v303_v21, 2  ;;  %v308_v33 = vperm.slane %v303_v21, 3 }
  0x3e   :  { %228 = vmatpush.msrb.mxu0 %v93_v35  ;;  %396 = vmatpush.msrb.mxu2 %v292_v52  ;;  %v309_v42 = vperm.slane %v303_v21, 4  ;;  %v310_v43 = vperm.slane %v303_v21, 5 }
  0x3f   :  { %248 = vmatpush.msrb.mxu1 %v109_v36  ;;  %377 = vmatpush.msra.mxu3 %v284_v53 }
  0x40   :  { %229 = vmatpush.msrb.mxu0 %v92_v37  ;;  %397 = vmatpush.msrb.mxu2 %v285_v54 }
  0x41   :  { %249 = vmatpush.msrb.mxu1 %v108_v38  ;;  %230 = vmatmul.f32.vlgmr.msrb.gmra.mxu0 %v25_v39 }
  0x42   :  { %250 = vmatmul.f32.vlgmr.msrb.gmra.mxu1 %v26_v40  ;;  %378 = vmatpush.msra.mxu3 %v277_v56 }
  0x43   :  { %398 = vmatpush.msrb.mxu2 %v278_v57  ;;  %v311_v57 = vperm.slane %v303_v21, 6 }
  0xaa   :  { %v151_v58 = vpop.f32.mrf.mxu0 }
  0xab   :  { %v152_v59 = vadd.f32 %v530_v55, %v151_v58 }
  0xad   :  { %v171_v60 = vpop.f32.mrf.mxu1  ;;  %v191_v62 = vpop.f32.mrf.mxu2 }
  0xae   :  { %v172_v61 = vadd.f32 %v171_v60, %v152_v59 }
  0xb0   :  { %v192_v63 = vadd.f32 %v191_v62, %v172_v61 }
  0xb1   :  { %v211_v0 = vpop.f32.mrf.mxu3 }
  0xb2   :  { %v212_v1 = vadd.f32 %v211_v0, %v192_v63 }
  0xb5   :  { %v271_v5 = vpop.f32.mrf.mxu2 }
  0xbe   :  { %v231_v2 = vpop.f32.mrf.mxu0 }
  0xbf   :  { %v251_v3 = vpop.f32.mrf.mxu1  ;;  %v232_v4 = vadd.f32 %v231_v2, %v212_v1 }
  0xc1   :  { %v252_v6 = vadd.f32 %v251_v3, %v232_v4 }
  0xc3   :  { %v272_v7 = vadd.f32 %v271_v5, %v252_v6 }
  0xc5   :  { %v274_v8 = vmax.f32 %v272_v7, 0.0 }
  0xc7   :  { %522 = vmatmul.msk.f32.vlgmr.msrb.gmra.mxu3 %vm319_vm1, %v274_v8  ;;  %523 = vmatmul.msk.f32.vlgmr.msra.gmra.mxu2 %vm319_vm1, %v274_v8 }
  0xc8   :  { %415 = vmatpush.msrb.mxu3 %v300_v9  ;;  %435 = vmatpush.msra.mxu2 %v301_v10 }
  0xca   :  { %416 = vmatpush.msrb.mxu3 %v293_v11  ;;  %436 = vmatpush.msra.mxu2 %v294_v12 }
  0xcc   :  { %417 = vmatpush.msrb.mxu3 %v286_v13  ;;  %437 = vmatpush.msra.mxu2 %v287_v14 }
  0xce   :  { %418 = vmatpush.msrb.mxu3 %v279_v15  ;;  %438 = vmatpush.msra.mxu2 %v280_v16 }
  0xcf   :  { %524 = vmatmul.msk.f32.vlgmr.msra.gmra.mxu3 %vm319_vm1, %v274_v8  ;;  %525 = vmatmul.msk.f32.vlgmr.msrb.gmra.mxu2 %vm319_vm1, %v274_v8 }
  0xd0   :  { %455 = vmatpush.msra.mxu3 %v302_v17 }
  0xd2   :  { %456 = vmatpush.msra.mxu3 %v295_v18 }
  0xd4   :  { %457 = vmatpush.msra.mxu3 %v288_v19 }
  0xd6   :  { %458 = vmatpush.msra.mxu3 %v281_v20 }
  0xd7   :  { %526 = vmatmul.msk.f32.vlgmr.msrb.gmra.mxu3 %vm319_vm1, %v274_v8  ;;  %527 = vmatmul.msk.f32.vlgmr.msra.gmra.mxu2 %vm319_vm1, %v274_v8 }
  0xdf   :  { %528 = vmatmul.msk.f32.vlgmr.msra.gmra.mxu3 %vm319_vm1, %v274_v8 }
 0x14a   :  { %v340_v24 = vpop.f32.mrf.mxu3  ;;  %v360_v25 = vpop.f32.mrf.mxu2 }
 0x14b   :  { %v341_v26 = vadd.f32 %v340_v24, %v305_v22  ;;  %v361_v27 = vadd.f32 %v360_v25, %v306_v23 }
 0x14d   :  { %v463_v28 = vsub.f32 0.0, %v341_v26  ;;  %v464_v29 = vsub.f32 0.0, %v361_v27 }
 0x14f   :  { %v470_v30 = vmul.f32 1.442695, %v463_v28  ;;  %v472_v31 = vmul.f32 1.442695, %v464_v29 }
 0x151   :  { %531 = vpow2.f32 %v470_v30 }
 0x152   :  { %533 = vpow2.f32 %v472_v31  ;;  %v380_v34 = vpop.f32.mrf.mxu3  ;;  %v400_v35 = vpop.f32.mrf.mxu2 }
 0x153   :  { %v381_v36 = vadd.f32 %v380_v34, %v307_v32  ;;  %v401_v37 = vadd.f32 %v400_v35, %v308_v33 }
 0x155   :  { %v465_v38 = vsub.f32 0.0, %v381_v36  ;;  %v466_v39 = vsub.f32 0.0, %v401_v37 }
 0x157   :  { %v532_v40 = vpop.eup %531  ;;  %v474_v41 = vmul.f32 1.442695, %v465_v38  ;;  %v476_v46 = vmul.f32 1.442695, %v466_v39 }
 0x158   :  { %v534_v44 = vpop.eup %533  ;;  %v484_v45 = vadd.f32 1.0, %v532_v40 }
 0x159   :  { %v485_v47 = vadd.f32 1.0, %v534_v44  ;;  %535 = vpow2.f32 %v474_v41 }
 0x15a   :  { %537 = vrcp.f32 %v484_v45  ;;  %v420_v48 = vpop.f32.mrf.mxu3  ;;  %v440_v49 = vpop.f32.mrf.mxu2 }
 0x15b   :  { %539 = vrcp.f32 %v485_v47  ;;  %v421_v50 = vadd.f32 %v420_v48, %v309_v42  ;;  %v441_v51 = vadd.f32 %v440_v49, %v310_v43 }
 0x15c   :  { %541 = vpow2.f32 %v476_v46 }
 0x15d   :  { %v467_v52 = vsub.f32 0.0, %v421_v50  ;;  %v468_v53 = vsub.f32 0.0, %v441_v51 }
 0x15f   :  { %v536_v54 = vpop.eup %535  ;;  %v478_v55 = vmul.f32 1.442695, %v467_v52  ;;  %v480_v56 = vmul.f32 1.442695, %v468_v53 }
 0x160   :  { %v538_v58 = vpop.eup %537  ;;  %v486_v59 = vadd.f32 1.0, %v536_v54 }
 0x161   :  { %v540_v60 = vpop.eup %539  ;;  %498 = vst [vmem:[#allocation2] sm:$0xff] %v538_v58  ;;  %543 = vpow2.f32 %v478_v55 }
 0x162   :  { %v542_v61 = vpop.eup %541  ;;  %499 = vst [vmem:[#allocation2 + $0x8] sm:$0xff] %v540_v60  ;;  %545 = vrcp.f32 %v486_v59  ;;  %v460_v62 = vpop.f32.mrf.mxu3 }
 0x163   :  { %v487_v63 = vadd.f32 1.0, %v542_v61  ;;  %547 = vpow2.f32 %v480_v56  ;;  %v461_v0 = vadd.f32 %v460_v62, %v311_v57 }
 0x165   :  { %549 = vrcp.f32 %v487_v63  ;;  %v469_v1 = vsub.f32 0.0, %v461_v0 }
 0x167   :  { %v544_v2 = vpop.eup %543  ;;  %v482_v3 = vmul.f32 1.442695, %v469_v1 }
 0x168   :  { %v546_v4 = vpop.eup %545  ;;  %v488_v5 = vadd.f32 1.0, %v544_v2 }
 0x169   :  { %v548_v6 = vpop.eup %547  ;;  %500 = vst [vmem:[#allocation2 + $0x10] sm:$0xff] %v546_v4  ;;  %551 = vpow2.f32 %v482_v3 }
 0x16a   :  { %553 = vrcp.f32 %v488_v5  ;;  %v489_v7 = vadd.f32 1.0, %v548_v6 }
 0x16b   :  { %v550_v8 = vpop.eup %549 }
 0x16c   :  { %501 = vst [vmem:[#allocation2 + $0x18] sm:$0xff] %v550_v8  ;;  %555 = vrcp.f32 %v489_v7 }
 0x16f   :  { %v552_v9 = vpop.eup %551 }
 0x170   :  { %v554_v10 = vpop.eup %553  ;;  %v490_v11 = vadd.f32 1.0, %v552_v9 }
 0x171   :  { %502 = vst [vmem:[#allocation2 + $0x20] sm:$0xff] %v554_v10 }
 0x172   :  { %v556_v12 = vpop.eup %555  ;;  %557 = vrcp.f32 %v490_v11 }
 0x173   :  { %503 = vst [vmem:[#allocation2 + $0x28] sm:$0xff] %v556_v12 }
 0x178   :  { %v558_v13 = vpop.eup %557 }
 0x179   :  { %504 = vst.msk [vmem:[#allocation2 + $0x30] sm:$0xff] %vm130_vm0, %v558_v13 }
 0x17a   :  { %515 = dma.vmem_to_hbm [thread:$0]  %s511_s4, 896, %s513_s2, [#allocation3]  }
 0x17b   :  { %583 = dma.done.wait [#allocation3], 896  }
 0x17c   :  { %584 = vsyncadd [#allocation3], 4294966400 }
 0x17d   :  { %520 = vsyncpa [#allocation3], 1 }

</bundles_post_ra>
